<compile_context>
chip_gen: v5e
topology: v5e:2x2
jax: 0.10.0
libtpu: 0.0.40
codegen_flags: <defaults>
</compile_context>

<pallas_src>
import jax
import jax.numpy as jnp
from jax.experimental import pallas as pl
from jax.experimental.pallas import tpu as pltpu

IN_DIM = 784
HID_DIM = 200
OUT_DIM = 10
HID_PAD = 256   # 200 -> 256: lane-dense hidden activation, native MXU width


def _round_up(x, m):
    return ((x + m - 1) // m) * m


def _choose_tiling(batch, max_tb=1024):
    """Pick a batch tile (multiple of 8) and padded batch size.

    Prefers the largest tile whose padding waste is small (dead rows still
    cost full DMA/MXU/EUP work), then guarantees >= 2 grid steps whenever
    possible so ("parallel",) can shard tiles over both v7x TensorCores.
    """
    tb = 8
    for cand in (1024, 512, 256, 128, 64, 32, 16, 8):
        if cand > max_tb:
            continue
        if _round_up(batch, cand) - batch <= max(cand // 4, 7):
            tb = cand
            break
    b_pad = _round_up(batch, tb)
    if b_pad // tb < 2 and b_pad >= 16:
        # Single tile -> split in two so the grid can use both v7x cores.
        tb = b_pad // 2          # b_pad is a power-of-two >= 16 here
    return tb, b_pad


def _sigmoid(v):
    # 1 / (1 + exp(-v)): exp and reciprocal both live on the otherwise-idle
    # EUP slot (approx reciprocal adds ~1e-3 error, inside the 2e-2 budget).
    return pl.reciprocal(1.0 + jnp.exp(-v), approx=True)


def _mlp_kernel(x_ref, w1_ref, b1_ref, w2_ref, b2_ref, o_ref):
    # x arrives as f32 straight from HBM; cast to bf16 in-kernel for the MXU.
    x = x_ref[...].astype(jnp.bfloat16)                       # (TB, 784)
    h = jnp.dot(x, w1_ref[...],
                preferred_element_type=jnp.float32)           # (TB, 256) f32 acc
    h = _sigmoid(h + b1_ref[...])                             # bias + sigmoid in f32
    y = jnp.dot(h.astype(jnp.bfloat16), w2_ref[...],
                preferred_element_type=jnp.float32)           # (TB, 10) f32 acc
    o_ref[...] = _sigmoid(y + b2_ref[...])


def prepare_params(w1, b1, w2, b2):
    """One-time weight padding / bf16 casting (hoisted out of the forward).

    w1: (784, 200), b1: (200,), w2: (200, 10), b2: (10,) -- already (in, out).
    """
    w1_p = jnp.zeros((IN_DIM, HID_PAD), jnp.bfloat16).at[:, :HID_DIM].set(
        w1.astype(jnp.bfloat16))
    b1_p = jnp.zeros((1, HID_PAD), jnp.float32).at[:, :HID_DIM].set(
        b1.astype(jnp.float32)[None, :])
    # Invariant: rows 200..255 of w2_p MUST stay zero so the padded hidden
    # columns (sigmoid(0) = 0.5) contribute nothing to the real outputs.
    w2_p = jnp.zeros((HID_PAD, OUT_DIM), jnp.bfloat16).at[:HID_DIM, :].set(
        w2.astype(jnp.bfloat16))
    b2_p = b2.astype(jnp.float32)[None, :]
    return w1_p, b1_p, w2_p, b2_p


@jax.jit
def classifire_forward(x, params):
    """x: (B, 784) f32, params = prepare_params(...). Returns (B, 10) f32."""
    w1_p, b1_p, w2_p, b2_p = params
    batch = x.shape[0]
    tb, b_pad = _choose_tiling(batch)

    # Row padding only when the batch is not tile-aligned (fuses under jit).
    x_p = x if b_pad == batch else jnp.pad(x, ((0, b_pad - batch), (0, 0)))

    out = pl.pallas_call(
        _mlp_kernel,
        out_shape=jax.ShapeDtypeStruct((b_pad, OUT_DIM), jnp.float32),
        grid=(b_pad // tb,),
        in_specs=[
            pl.BlockSpec((tb, IN_DIM), lambda i: (i, 0)),       # x: tiled over batch
            pl.BlockSpec((IN_DIM, HID_PAD), lambda i: (0, 0)),  # weights stay VMEM-resident
            pl.BlockSpec((1, HID_PAD), lambda i: (0, 0)),
            pl.BlockSpec((HID_PAD, OUT_DIM), lambda i: (0, 0)),
            pl.BlockSpec((1, OUT_DIM), lambda i: (0, 0)),
        ],
        out_specs=pl.BlockSpec((tb, OUT_DIM), lambda i: (i, 0)),
        compiler_params=pltpu.CompilerParams(
            dimension_semantics=("parallel",)),
    )(x_p, w1_p, b1_p, w2_p, b2_p)

    return out if b_pad == batch else out[:batch]


def init_params(key):
    """Deterministic init mimicking PyTorch nn.Linear: U(-1/sqrt(fan_in), ...)."""
    k1, k2, k3, k4 = jax.random.split(key, 4)
    bound1 = 1.0 / jnp.sqrt(IN_DIM)
    bound2 = 1.0 / jnp.sqrt(HID_DIM)
    # Stored already transposed to (in, out) for the kernel.
    w1 = jax.random.uniform(k1, (IN_DIM, HID_DIM), jnp.float32, -bound1, bound1)
    b1 = jax.random.uniform(k2, (HID_DIM,), jnp.float32, -bound1, bound1)
    w2 = jax.random.uniform(k3, (HID_DIM, OUT_DIM), jnp.float32, -bound2, bound2)
    b2 = jax.random.uniform(k4, (OUT_DIM,), jnp.float32, -bound2, bound2)
    return w1, b1, w2, b2


if __name__ == "__main__":
    key = jax.random.PRNGKey(0)
    k_params, k_x1, k_x2 = jax.random.split(key, 3)
    w1, b1, w2, b2 = init_params(k_params)
    params = prepare_params(w1, b1, w2, b2)           # one-time padding/cast

    def ref(x):
        return jax.nn.sigmoid(jax.nn.sigmoid(x @ w1 + b1) @ w2 + b2)

    # Tile-aligned small batch (single grid step).
    x1 = jax.random.uniform(k_x1, (8, IN_DIM), jnp.float32)   # MNIST-style [0,1)
    out1 = jax.block_until_ready(classifire_forward(x1, params))
    assert out1.shape == (8, OUT_DIM)
    err1 = float(jnp.max(jnp.abs(out1 - ref(x1))))
    assert jnp.allclose(out1, ref(x1), atol=2e-2, rtol=0.0), err1

    # Non-tile-aligned batch: exercises batch padding + multi-step grid.
    x2 = jax.random.uniform(k_x2, (37, IN_DIM), jnp.float32)
    out2 = jax.block_until_ready(classifire_forward(x2, params))
    assert out2.shape == (37, OUT_DIM)
    err2 = float(jnp.max(jnp.abs(out2 - ref(x2))))
    assert jnp.allclose(out2, ref(x2), atol=2e-2, rtol=0.0), err2

    print("KERNEL_OK")
</pallas_src>

<mosaic_0001>
module attributes {stable_mosaic.version = 11 : i64} {
  func.func @_mlp_kernel(%arg0: i32, %arg1: memref<8x784xf32, #tpu.memory_space<vmem>>, %arg2: memref<784x256xbf16, #tpu.memory_space<vmem>>, %arg3: memref<1x256xf32, #tpu.memory_space<vmem>>, %arg4: memref<256x10xbf16, #tpu.memory_space<vmem>>, %arg5: memref<1x10xf32, #tpu.memory_space<vmem>>, %arg6: memref<8x10xf32, #tpu.memory_space<vmem>>) attributes {dimension_semantics = [#tpu.dimension_semantics<parallel>], iteration_bounds = array<i64: 1>, scalar_prefetch = 0 : i64, scratch_operands = 0 : i64, tpu.core_type = #tpu.core_type<tc>, window_params = [{transform_indices = @transform_0, window_bounds = array<i64: 8, 784>}, {pipeline_mode = #tpu.pipeline_mode<synchronous>, transform_indices = @transform_1, window_bounds = array<i64: 784, 256>}, {pipeline_mode = #tpu.pipeline_mode<synchronous>, transform_indices = @transform_2, window_bounds = array<i64: 1, 256>}, {pipeline_mode = #tpu.pipeline_mode<synchronous>, transform_indices = @transform_3, window_bounds = array<i64: 256, 10>}, {pipeline_mode = #tpu.pipeline_mode<synchronous>, transform_indices = @transform_4, window_bounds = array<i64: 1, 10>}, {transform_indices = @transform_5, window_bounds = array<i64: 8, 10>}]} {
    %c0 = arith.constant 0 : index
    %c0_0 = arith.constant 0 : index
    %0 = vector.load %arg1[%c0, %c0_0] : memref<8x784xf32, #tpu.memory_space<vmem>>, vector<8x784xf32>
    %1 = arith.truncf %0 : vector<8x784xf32> to vector<8x784xbf16>
    %c0_1 = arith.constant 0 : index
    %c0_2 = arith.constant 0 : index
    %2 = vector.load %arg2[%c0_1, %c0_2] : memref<784x256xbf16, #tpu.memory_space<vmem>>, vector<784x256xbf16>
    %cst = arith.constant dense<0.000000e+00> : vector<8x256xf32>
    %3 = tpu.matmul %1, %2, %cst {dimension_numbers = #tpu.dot_dimension_numbers<[1], [0], [0], [1], [0, 0, 1, 1], [], []>} : vector<8x784xbf16>, vector<784x256xbf16>, vector<8x256xf32> -> vector<8x256xf32>
    %c0_3 = arith.constant 0 : index
    %c0_4 = arith.constant 0 : index
    %4 = vector.load %arg3[%c0_3, %c0_4] : memref<1x256xf32, #tpu.memory_space<vmem>>, vector<1x256xf32>
    %5 = vector.broadcast %4 : vector<1x256xf32> to vector<8x256xf32>
    %6 = arith.addf %3, %5 : vector<8x256xf32>
    %cst_5 = arith.constant 0.000000e+00 : f32
    %7 = vector.broadcast %cst_5 : f32 to vector<8x256xf32>
    %8 = arith.subf %7, %6 : vector<8x256xf32>
    %9 = math.exp %8 : vector<8x256xf32>
    %cst_6 = arith.constant 1.000000e+00 : f32
    %10 = vector.broadcast %cst_6 : f32 to vector<8x256xf32>
    %11 = arith.addf %10, %9 : vector<8x256xf32>
    %12 = tpu.reciprocal %11 {approx = true} : vector<8x256xf32> -> vector<8x256xf32>
    %13 = arith.truncf %12 : vector<8x256xf32> to vector<8x256xbf16>
    %c0_7 = arith.constant 0 : index
    %c0_8 = arith.constant 0 : index
    %14 = vector.load %arg4[%c0_7, %c0_8] : memref<256x10xbf16, #tpu.memory_space<vmem>>, vector<256x10xbf16>
    %cst_9 = arith.constant dense<0.000000e+00> : vector<8x10xf32>
    %15 = tpu.matmul %13, %14, %cst_9 {dimension_numbers = #tpu.dot_dimension_numbers<[1], [0], [0], [1], [0, 0, 1, 1], [], []>} : vector<8x256xbf16>, vector<256x10xbf16>, vector<8x10xf32> -> vector<8x10xf32>
    %c0_10 = arith.constant 0 : index
    %c0_11 = arith.constant 0 : index
    %16 = vector.load %arg5[%c0_10, %c0_11] : memref<1x10xf32, #tpu.memory_space<vmem>>, vector<1x10xf32>
    %17 = vector.broadcast %16 : vector<1x10xf32> to vector<8x10xf32>
    %18 = arith.addf %15, %17 : vector<8x10xf32>
    %cst_12 = arith.constant 0.000000e+00 : f32
    %19 = vector.broadcast %cst_12 : f32 to vector<8x10xf32>
    %20 = arith.subf %19, %18 : vector<8x10xf32>
    %21 = math.exp %20 : vector<8x10xf32>
    %cst_13 = arith.constant 1.000000e+00 : f32
    %22 = vector.broadcast %cst_13 : f32 to vector<8x10xf32>
    %23 = arith.addf %22, %21 : vector<8x10xf32>
    %24 = tpu.reciprocal %23 {approx = true} : vector<8x10xf32> -> vector<8x10xf32>
    %c0_14 = arith.constant 0 : index
    %c0_15 = arith.constant 0 : index
    %25 = vector.load %arg6[%c0_14, %c0_15] : memref<8x10xf32, #tpu.memory_space<vmem>>, vector<8x10xf32>
    tpu.vector_store %arg6[%c0_14, %c0_15], %24 {strides = array<i32>} : memref<8x10xf32, #tpu.memory_space<vmem>>, vector<8x10xf32>,
    return
  }
  func.func @transform_0(%arg0: i32) -> (i32, i32) {
    %c0_i32 = arith.constant 0 : i32
    %c0_i32_0 = arith.constant 0 : i32
    return %arg0, %c0_i32 : i32, i32
  }
  func.func @transform_1(%arg0: i32) -> (i32, i32) {
    %c0_i32 = arith.constant 0 : i32
    %c0_i32_0 = arith.constant 0 : i32
    %c0_i32_1 = arith.constant 0 : i32
    return %c0_i32, %c0_i32_0 : i32, i32
  }
  func.func @transform_2(%arg0: i32) -> (i32, i32) {
    %c0_i32 = arith.constant 0 : i32
    %c0_i32_0 = arith.constant 0 : i32
    %c0_i32_1 = arith.constant 0 : i32
    return %c0_i32, %c0_i32_0 : i32, i32
  }
  func.func @transform_3(%arg0: i32) -> (i32, i32) {
    %c0_i32 = arith.constant 0 : i32
    %c0_i32_0 = arith.constant 0 : i32
    %c0_i32_1 = arith.constant 0 : i32
    return %c0_i32, %c0_i32_0 : i32, i32
  }
  func.func @transform_4(%arg0: i32) -> (i32, i32) {
    %c0_i32 = arith.constant 0 : i32
    %c0_i32_0 = arith.constant 0 : i32
    %c0_i32_1 = arith.constant 0 : i32
    return %c0_i32, %c0_i32_0 : i32, i32
  }
  func.func @transform_5(%arg0: i32) -> (i32, i32) {
    %c0_i32 = arith.constant 0 : i32
    %c0_i32_0 = arith.constant 0 : i32
    return %arg0, %c0_i32 : i32, i32
  }
}

</mosaic_0001>

<bundles_post_ra>
// kernel: classifire_forward.1
= control target key start
LH: loop header
LB: loop body
LE: loop exit
PB: predicated region body
PF: predicated region fallthrough
CT: control target
= control target key end

     0   :  { %10 = vsyncpa [#allocation3], 0  ;;  %s1812_s0 = inlined_call_operand.vmem [shape: f32[8,784], index: 0, kind: input, shape index: {}]   ;;  %s1813_s1 = inlined_call_operand.hbm [shape: bf16[784,256], index: 1, kind: input, shape index: {}]   ;;  %s1814_s2 = inlined_call_operand.vmem [shape: f32[1,256], index: 2, kind: input, shape index: {}]   ;;  %s1815_s3 = inlined_call_operand.vmem [shape: bf16[256,10], index: 3, kind: input, shape index: {}]   ;;  %s1816_s4 = inlined_call_operand.vmem [shape: f32[1,10], index: 4, kind: input, shape index: {}]   ;;  %s1817_s5 = inlined_call_operand.hbm [shape: f32[8,10], index: 5, kind: output, shape index: {}]  }
   0x1   :  { %11 = vsyncpa [#allocation4], 0  ;;  %s18_s20 = sshll.u32 %s1813_s1, 4  ;;  %s1667_s21 = smov [#allocation2]   ;;  %s19_s20 = int_to_ptr.hbm [resolvable:$true] %s18_s20 }
   0x2   :  { %s20_s22 = sshll.u32 %s1667_s21, 4  ;;  %s1668_s23 = smov 128   ;;  %s21_s22 = int_to_ptr.vmem [resolvable:$true] %s20_s22 }
   0x3   :  { %s1669_s24 = smov 8  }
   0x4   :  { %26 = dma.hbm_to_vmem [thread:$0]  %s19_s20, 12544, %s21_s22, [#allocation3], %s1668_s23, %s1668_s23, %s1669_s24  }
   0x5   :  { %1663 = dma.done.wait [#allocation3], 12544  }
   0x6   :  { %1664 = vsyncadd [#allocation3], 4294954752  ;;  %v1084_v0 = vld [vmem:[#allocation2 + $0x70] sm:$0xf]  ;;  %v1499_v1 = vld [vmem:[#allocation2 + $0x74] sm:$0xf0] }
   0x7   :  { %v1212_v2 = vld [vmem:[#allocation2 + $0x170] sm:$0xf]  ;;  %v1085_v3 = vor.u32 %v1499_v1, %v1084_v0  ;;  %v1531_v4 = vld [vmem:[#allocation2 + $0x174] sm:$0xf0]  ;;  %v1076_v11 = vld [vmem:[#allocation2 + $0x60] sm:$0xf] }
   0x8   :  { %v1276_v5 = vld [vmem:[#allocation2 + $0x1f0] sm:$0xf]  ;;  %v1547_v6 = vld [vmem:[#allocation2 + $0x1f4] sm:$0xf0]  ;;  %v1213_v7 = vor.u32 %v1531_v4, %v1212_v2  ;;  %v1497_v13 = vld [vmem:[#allocation2 + $0x64] sm:$0xf0] }
   0x9   :  { %v1277_v8 = vor.u32 %v1547_v6, %v1276_v5  ;;  %v1148_v9 = vld [vmem:[#allocation2 + $0xf0] sm:$0xf]  ;;  %v1515_v10 = vld [vmem:[#allocation2 + $0xf4] sm:$0xf0]  ;;  %650 = vmatpush.bf16.msra.mxu0 %v1085_v3  ;;  %v1204_v14 = vld [vmem:[#allocation2 + $0x160] sm:$0xf]  ;;  %v1077_v16 = vor.u32 %v1497_v13, %v1076_v11 }
   0xa   :  { %v1149_v12 = vor.u32 %v1515_v10, %v1148_v9  ;;  %v1529_v15 = vld [vmem:[#allocation2 + $0x164] sm:$0xf0]  ;;  %676 = vmatpush.bf16.msra.mxu2 %v1213_v7  ;;  %v1268_v18 = vld [vmem:[#allocation2 + $0x1e0] sm:$0xf]  ;;  %v1068_v23 = vld [vmem:[#allocation2 + $0x50] sm:$0xf] }
   0xb   :  { %689 = vmatpush.bf16.msra.mxu3 %v1277_v8  ;;  %v1205_v17 = vor.u32 %v1529_v15, %v1204_v14  ;;  %v1545_v19 = vld [vmem:[#allocation2 + $0x1e4] sm:$0xf0]  ;;  %v1140_v20 = vld [vmem:[#allocation2 + $0xe0] sm:$0xf]  ;;  %v1495_v24 = vld [vmem:[#allocation2 + $0x54] sm:$0xf0] }
   0xc   :  { %663 = vmatpush.bf16.msra.mxu1 %v1149_v12  ;;  %v1269_v21 = vor.u32 %v1545_v19, %v1268_v18  ;;  %v1513_v22 = vld [vmem:[#allocation2 + $0xe4] sm:$0xf0]  ;;  %v1196_v26 = vld [vmem:[#allocation2 + $0x150] sm:$0xf]  ;;  %v1527_v27 = vld [vmem:[#allocation2 + $0x154] sm:$0xf0]  ;;  %v1069_v29 = vor.u32 %v1495_v24, %v1068_v23 }
   0xd   :  { %v1141_v25 = vor.u32 %v1513_v22, %v1140_v20  ;;  %v1260_v28 = vld [vmem:[#allocation2 + $0x1d0] sm:$0xf]  ;;  %651 = vmatpush.bf16.msra.mxu0 %v1077_v16  ;;  %v1543_v30 = vld [vmem:[#allocation2 + $0x1d4] sm:$0xf0]  ;;  %v1197_v33 = vor.u32 %v1527_v27, %v1196_v26  ;;  %v1060_v35 = vld [vmem:[#allocation2 + $0x40] sm:$0xf] }
   0xe   :  { %v1132_v31 = vld [vmem:[#allocation2 + $0xd0] sm:$0xf]  ;;  %v1511_v32 = vld [vmem:[#allocation2 + $0xd4] sm:$0xf0]  ;;  %677 = vmatpush.bf16.msra.mxu2 %v1205_v17  ;;  %v1261_v34 = vor.u32 %v1543_v30, %v1260_v28  ;;  %v1493_v36 = vld [vmem:[#allocation2 + $0x44] sm:$0xf0] }
   0xf   :  { %690 = vmatpush.bf16.msra.mxu3 %v1269_v21  ;;  %v1188_v37 = vld [vmem:[#allocation2 + $0x140] sm:$0xf]  ;;  %v1133_v38 = vor.u32 %v1511_v32, %v1132_v31  ;;  %v1525_v39 = vld [vmem:[#allocation2 + $0x144] sm:$0xf0]  ;;  %v1061_v44 = vor.u32 %v1493_v36, %v1060_v35  ;;  %v1052_v47 = vld [vmem:[#allocation2 + $0x30] sm:$0xf] }
  0x10   :  { %664 = vmatpush.bf16.msra.mxu1 %v1141_v25  ;;  %v1252_v40 = vld [vmem:[#allocation2 + $0x1c0] sm:$0xf]  ;;  %v1541_v41 = vld [vmem:[#allocation2 + $0x1c4] sm:$0xf0]  ;;  %v1189_v45 = vor.u32 %v1525_v39, %v1188_v37  ;;  %v1491_v48 = vld [vmem:[#allocation2 + $0x34] sm:$0xf0] }
  0x11   :  { %v1124_v42 = vld [vmem:[#allocation2 + $0xc0] sm:$0xf]  ;;  %v1509_v43 = vld [vmem:[#allocation2 + $0xc4] sm:$0xf0]  ;;  %652 = vmatpush.bf16.msra.mxu0 %v1069_v29  ;;  %v1253_v46 = vor.u32 %v1541_v41, %v1252_v40  ;;  %v1180_v49 = vld [vmem:[#allocation2 + $0x130] sm:$0xf]  ;;  %v1053_v56 = vor.u32 %v1491_v48, %v1052_v47 }
  0x12   :  { %678 = vmatpush.bf16.msra.mxu2 %v1197_v33  ;;  %v1125_v50 = vor.u32 %v1509_v43, %v1124_v42  ;;  %v1523_v51 = vld [vmem:[#allocation2 + $0x134] sm:$0xf0]  ;;  %v1244_v52 = vld [vmem:[#allocation2 + $0x1b0] sm:$0xf]  ;;  %v1044_v59 = vld [vmem:[#allocation2 + $0x20] sm:$0xf] }
  0x13   :  { %691 = vmatpush.bf16.msra.mxu3 %v1261_v34  ;;  %v1539_v53 = vld [vmem:[#allocation2 + $0x1b4] sm:$0xf0]  ;;  %v1116_v54 = vld [vmem:[#allocation2 + $0xb0] sm:$0xf]  ;;  %v1181_v57 = vor.u32 %v1523_v51, %v1180_v49  ;;  %v1489_v60 = vld [vmem:[#allocation2 + $0x24] sm:$0xf0] }
  0x14   :  { %665 = vmatpush.bf16.msra.mxu1 %v1133_v38  ;;  %v1507_v55 = vld [vmem:[#allocation2 + $0xb4] sm:$0xf0]  ;;  %v1245_v58 = vor.u32 %v1539_v53, %v1244_v52  ;;  %v1172_v61 = vld [vmem:[#allocation2 + $0x120] sm:$0xf]  ;;  %v1521_v63 = vld [vmem:[#allocation2 + $0x124] sm:$0xf0]  ;;  %v1045_v4 = vor.u32 %v1489_v60, %v1044_v59 }
  0x15   :  { %653 = vmatpush.bf16.msra.mxu0 %v1061_v44  ;;  %v1117_v62 = vor.u32 %v1507_v55, %v1116_v54  ;;  %v1236_v0 = vld [vmem:[#allocation2 + $0x1a0] sm:$0xf]  ;;  %v1537_v1 = vld [vmem:[#allocation2 + $0x1a4] sm:$0xf0]  ;;  %v1173_v5 = vor.u32 %v1521_v63, %v1172_v61  ;;  %v1036_v7 = vld [vmem:[#allocation2 + $0x10] sm:$0xf] }
  0x16   :  { %679 = vmatpush.bf16.msra.mxu2 %v1189_v45  ;;  %v1108_v2 = vld [vmem:[#allocation2 + $0xa0] sm:$0xf]  ;;  %v1505_v3 = vld [vmem:[#allocation2 + $0xa4] sm:$0xf0]  ;;  %v1237_v6 = vor.u32 %v1537_v1, %v1236_v0  ;;  %v1487_v8 = vld [vmem:[#allocation2 + $0x14] sm:$0xf0] }
  0x17   :  { %692 = vmatpush.bf16.msra.mxu3 %v1253_v46  ;;  %v1164_v9 = vld [vmem:[#allocation2 + $0x110] sm:$0xf]  ;;  %v1109_v10 = vor.u32 %v1505_v3, %v1108_v2  ;;  %v1519_v11 = vld [vmem:[#allocation2 + $0x114] sm:$0xf0]  ;;  %v1037_v16 = vor.u32 %v1487_v8, %v1036_v7  ;;  %v1028_v17 = vld [vmem:[#allocation2] sm:$0xf] }
  0x18   :  { %666 = vmatpush.bf16.msra.mxu1 %v1125_v50  ;;  %v1228_v12 = vld [vmem:[#allocation2 + $0x190] sm:$0xf]  ;;  %v1535_v13 = vld [vmem:[#allocation2 + $0x194] sm:$0xf0]  ;;  %v1485_v18 = vld [vmem:[#allocation2 + $0x4] sm:$0xf0]  ;;  %v1165_v20 = vor.u32 %v1519_v11, %v1164_v9 }
  0x19   :  { %654 = vmatpush.bf16.msra.mxu0 %v1053_v56  ;;  %v1100_v14 = vld [vmem:[#allocation2 + $0x90] sm:$0xf]  ;;  %v1503_v15 = vld [vmem:[#allocation2 + $0x94] sm:$0xf0]  ;;  %v1156_v19 = vld [vmem:[#allocation2 + $0x100] sm:$0xf]  ;;  %v1229_v21 = vor.u32 %v1535_v13, %v1228_v12  ;;  %v1029_v32 = vor.u32 %v1485_v18, %v1028_v17 }
  0x1a   :  { %680 = vmatpush.bf16.msra.mxu2 %v1181_v57  ;;  %v1517_v22 = vld [vmem:[#allocation2 + $0x104] sm:$0xf0]  ;;  %v1220_v23 = vld [vmem:[#allocation2 + $0x180] sm:$0xf]  ;;  %v1101_v25 = vor.u32 %v1503_v15, %v1100_v14  ;;  %v1340_v26 = vld [vmem:[#allocation2 + $0x270] sm:$0xf] }
  0x1b   :  { %693 = vmatpush.bf16.msra.mxu3 %v1245_v58  ;;  %v1533_v24 = vld [vmem:[#allocation2 + $0x184] sm:$0xf0]  ;;  %v1563_v27 = vld [vmem:[#allocation2 + $0x274] sm:$0xf0]  ;;  %v1498_v28 = vld [vmem:[#allocation2 + $0x74] sm:$0xf]  ;;  %v1157_v36 = vor.u32 %v1517_v22, %v1156_v19 }
  0x1c   :  { %667 = vmatpush.bf16.msra.mxu1 %v1117_v62  ;;  %v1086_v29 = vld [vmem:[#allocation2 + $0x78] sm:$0xf0]  ;;  %v1092_v30 = vld [vmem:[#allocation2 + $0x80] sm:$0xf]  ;;  %v1501_v31 = vld [vmem:[#allocation2 + $0x84] sm:$0xf0]  ;;  %v1221_v37 = vor.u32 %v1533_v24, %v1220_v23  ;;  %v1341_v41 = vor.u32 %v1563_v27, %v1340_v26 }
  0x1d   :  { %655 = vmatpush.bf16.msra.mxu0 %v1045_v4  ;;  %v40_v33 = vld [vmem:[%s1812_s0 + $0x10] sm:$0xff]  ;;  %v1412_v34 = vld [vmem:[#allocation2 + $0x300] sm:$0xf]  ;;  %v1581_v35 = vld [vmem:[#allocation2 + $0x304] sm:$0xf0]  ;;  %v1089_v42 = vor.u32 %v1498_v28, %v1086_v29  ;;  %v1093_v46 = vor.u32 %v1501_v31, %v1092_v30  ;;  %vm646_vm0 = vcmask 130048  }
  0x1e   :  { %681 = vmatpush.bf16.msra.mxu2 %v1173_v5  ;;  %v1404_v38 = vld [vmem:[#allocation2 + $0x2f0] sm:$0xf]  ;;  %v1579_v39 = vld [vmem:[#allocation2 + $0x2f4] sm:$0xf0]  ;;  %v1514_v40 = vld [vmem:[#allocation2 + $0xf4] sm:$0xf]  ;;  %v1413_v47 = vor.u32 %v1581_v35, %v1412_v34  ;;  %v1710_v51 = vpack.c.bf16 %v40_v33, %v40_v33 }
  0x1f   :  { %694 = vmatpush.bf16.msra.mxu3 %v1237_v6  ;;  %v1150_v43 = vld [vmem:[#allocation2 + $0xf8] sm:$0xf0]  ;;  %v1332_v44 = vld [vmem:[#allocation2 + $0x260] sm:$0xf]  ;;  %v1561_v48 = vld [vmem:[#allocation2 + $0x264] sm:$0xf0]  ;;  %v1405_v52 = vor.u32 %v1579_v39, %v1404_v38 }
  0x20   :  { %668 = vmatpush.bf16.msra.mxu1 %v1109_v10  ;;  %v38_v45 = vld [vmem:[%s1812_s0] sm:$0xff]  ;;  %v1078_v50 = vld [vmem:[#allocation2 + $0x68] sm:$0xf0]  ;;  %v41_v53 = vld [vmem:[%s1812_s0 + $0x18] sm:$0xff]  ;;  %v1153_v55 = vor.u32 %v1514_v40, %v1150_v43  ;;  %v1333_v59 = vor.u32 %v1561_v48, %v1332_v44  ;;  %s1670_s19 = smov [#allocation5]   ;;  %s1016_s23 = sshll.u32 %s1817_s5, 4  ;;  %s1017_s23 = int_to_ptr.hbm [resolvable:$true] %s1016_s23 }
  0x21   :  { %656 = vmatpush.bf16.msra.mxu0 %v1037_v16  ;;  %v1496_v49 = vld [vmem:[#allocation2 + $0x64] sm:$0xf]  ;;  %v39_v54 = vld [vmem:[%s1812_s0 + $0x8] sm:$0xff]  ;;  %v1396_v56 = vld [vmem:[#allocation2 + $0x2e0] sm:$0xf]  ;;  %v1718_v58 = vpack.c.bf16 %v38_v45, %v38_v45  ;;  %v1720_v3 = vpack.c.bf16 %v41_v53, %v41_v53  ;;  %s1014_s20 = sshll.u32 %s1670_s19, 4  ;;  %s1015_s20 = int_to_ptr.vmem [resolvable:$true] %s1014_s20 }
  0x22   :  { %682 = vmatpush.bf16.msra.mxu2 %v1165_v20  ;;  %v1577_v57 = vld [vmem:[#allocation2 + $0x2e4] sm:$0xf0]  ;;  %v1081_v60 = vor.u32 %v1496_v49, %v1078_v50  ;;  %v1512_v61 = vld [vmem:[#allocation2 + $0xe4] sm:$0xf]  ;;  %v1142_v62 = vld [vmem:[#allocation2 + $0xe8] sm:$0xf0]  ;;  %v1722_v4 = vpack.c.bf16 %v39_v54, %v39_v54 }
  0x23   :  { %695 = vmatpush.bf16.msra.mxu3 %v1229_v21  ;;  %v1324_v63 = vld [vmem:[#allocation2 + $0x250] sm:$0xf]  ;;  %v1559_v0 = vld [vmem:[#allocation2 + $0x254] sm:$0xf0]  ;;  %v1494_v1 = vld [vmem:[#allocation2 + $0x54] sm:$0xf]  ;;  %v1397_v5 = vor.u32 %v1577_v57, %v1396_v56  ;;  %v1145_v6 = vor.u32 %v1512_v61, %v1142_v62 }
  0x24   :  { %669 = vmatpush.bf16.msra.mxu1 %v1101_v25  ;;  %v1070_v2 = vld [vmem:[#allocation2 + $0x58] sm:$0xf0]  ;;  %v1388_v7 = vld [vmem:[#allocation2 + $0x2d0] sm:$0xf]  ;;  %v1575_v8 = vld [vmem:[#allocation2 + $0x2d4] sm:$0xf0]  ;;  %v1325_v9 = vor.u32 %v1559_v0, %v1324_v63 }
  0x25   :  { %657 = vmatpush.bf16.msra.mxu0 %v1029_v32  ;;  %v1073_v10 = vor.u32 %v1494_v1, %v1070_v2  ;;  %v1510_v11 = vld [vmem:[#allocation2 + $0xd4] sm:$0xf]  ;;  %v1134_v12 = vld [vmem:[#allocation2 + $0xd8] sm:$0xf0]  ;;  %v1316_v13 = vld [vmem:[#allocation2 + $0x240] sm:$0xf]  ;;  %v1389_v17 = vor.u32 %v1575_v8, %v1388_v7 }
  0x26   :  { %683 = vmatpush.bf16.msra.mxu2 %v1157_v36  ;;  %v1557_v14 = vld [vmem:[#allocation2 + $0x244] sm:$0xf0]  ;;  %v1492_v15 = vld [vmem:[#allocation2 + $0x44] sm:$0xf]  ;;  %v1062_v16 = vld [vmem:[#allocation2 + $0x48] sm:$0xf0]  ;;  %v1137_v18 = vor.u32 %v1510_v11, %v1134_v12 }
  0x27   :  { %696 = vmatpush.bf16.msra.mxu3 %v1221_v37  ;;  %v1380_v19 = vld [vmem:[#allocation2 + $0x2c0] sm:$0xf]  ;;  %v1573_v20 = vld [vmem:[#allocation2 + $0x2c4] sm:$0xf0]  ;;  %v1317_v21 = vor.u32 %v1557_v14, %v1316_v13  ;;  %v1065_v22 = vor.u32 %v1492_v15, %v1062_v16  ;;  %v1508_v23 = vld [vmem:[#allocation2 + $0xc4] sm:$0xf] }
  0x28   :  { %670 = vmatpush.bf16.msra.mxu1 %v1093_v46  ;;  %658 = vmatmul.bf16.vlgmr.msra.gmra.mxu0 %v1718_v58  ;;  %v1126_v24 = vld [vmem:[#allocation2 + $0xc8] sm:$0xf0]  ;;  %v1308_v25 = vld [vmem:[#allocation2 + $0x230] sm:$0xf]  ;;  %v1555_v26 = vld [vmem:[#allocation2 + $0x234] sm:$0xf0]  ;;  %v1381_v29 = vor.u32 %v1573_v20, %v1380_v19 }
  0x29   :  { %702 = vmatpush.bf16.msrb.mxu0 %v1341_v41  ;;  %684 = vmatmul.bf16.vlgmr.msra.gmra.mxu2 %v1710_v51  ;;  %v1490_v27 = vld [vmem:[#allocation2 + $0x34] sm:$0xf]  ;;  %v1054_v28 = vld [vmem:[#allocation2 + $0x38] sm:$0xf0]  ;;  %v1129_v30 = vor.u32 %v1508_v23, %v1126_v24  ;;  %v1372_v31 = vld [vmem:[#allocation2 + $0x2b0] sm:$0xf]  ;;  %v1309_v34 = vor.u32 %v1555_v26, %v1308_v25 }
  0x2a   :  { %735 = vmatpush.bf16.msrb.mxu2 %v1413_v47  ;;  %697 = vmatmul.bf16.vlgmr.msra.gmra.mxu3 %v1720_v3  ;;  %v1571_v32 = vld [vmem:[#allocation2 + $0x2b4] sm:$0xf0]  ;;  %v44_v33 = vld [vmem:[%s1812_s0 + $0x30] sm:$0xff]  ;;  %v1057_v35 = vor.u32 %v1490_v27, %v1054_v28  ;;  %v1118_v37 = vld [vmem:[#allocation2 + $0xb8] sm:$0xf0]  ;;  %vm1007_vm1 = vcmask 80896  }
  0x2b   :  { %741 = vmatpush.bf16.msrb.mxu3 %v1089_v42  ;;  %671 = vmatmul.bf16.vlgmr.msra.gmra.mxu1 %v1722_v4  ;;  %v1506_v36 = vld [vmem:[#allocation2 + $0xb4] sm:$0xf]  ;;  %v1300_v38 = vld [vmem:[#allocation2 + $0x220] sm:$0xf]  ;;  %v1553_v39 = vld [vmem:[#allocation2 + $0x224] sm:$0xf0]  ;;  %v1373_v42 = vor.u32 %v1571_v32, %v1372_v31  ;;  %v1731_v43 = vpack.c.bf16 %v44_v33, %v44_v33 }
  0x2c   :  { %715 = vmatpush.bf16.msrb.mxu1 %v1405_v52  ;;  %v1488_v40 = vld [vmem:[#allocation2 + $0x24] sm:$0xf]  ;;  %v1046_v41 = vld [vmem:[#allocation2 + $0x28] sm:$0xf0]  ;;  %v1121_v44 = vor.u32 %v1506_v36, %v1118_v37  ;;  %v1364_v45 = vld [vmem:[#allocation2 + $0x2a0] sm:$0xf]  ;;  %v1301_v47 = vor.u32 %v1553_v39, %v1300_v38 }
  0x2d   :  { %703 = vmatpush.bf16.msrb.mxu0 %v1333_v59  ;;  %v1569_v46 = vld [vmem:[#allocation2 + $0x2a4] sm:$0xf0]  ;;  %v1049_v48 = vor.u32 %v1488_v40, %v1046_v41  ;;  %v1504_v49 = vld [vmem:[#allocation2 + $0xa4] sm:$0xf]  ;;  %v1110_v50 = vld [vmem:[#allocation2 + $0xa8] sm:$0xf0] }
  0x2e   :  { %754 = vmatpush.bf16.msra.mxu2 %v1153_v55  ;;  %v1292_v52 = vld [vmem:[#allocation2 + $0x210] sm:$0xf]  ;;  %v1551_v53 = vld [vmem:[#allocation2 + $0x214] sm:$0xf0]  ;;  %v1486_v54 = vld [vmem:[#allocation2 + $0x14] sm:$0xf]  ;;  %v1365_v56 = vor.u32 %v1569_v46, %v1364_v45  ;;  %v1113_v57 = vor.u32 %v1504_v49, %v1110_v50 }
  0x2f   :  { %742 = vmatpush.bf16.msrb.mxu3 %v1081_v60  ;;  %v1038_v55 = vld [vmem:[#allocation2 + $0x18] sm:$0xf0]  ;;  %v1356_v59 = vld [vmem:[#allocation2 + $0x290] sm:$0xf]  ;;  %v1567_v60 = vld [vmem:[#allocation2 + $0x294] sm:$0xf0]  ;;  %v1293_v62 = vor.u32 %v1551_v53, %v1292_v52 }
  0x30   :  { %716 = vmatpush.bf16.msrb.mxu1 %v1397_v5  ;;  %v1502_v61 = vld [vmem:[#allocation2 + $0x94] sm:$0xf]  ;;  %v1041_v63 = vor.u32 %v1486_v54, %v1038_v55  ;;  %v1102_v0 = vld [vmem:[#allocation2 + $0x98] sm:$0xf0]  ;;  %v1284_v1 = vld [vmem:[#allocation2 + $0x200] sm:$0xf]  ;;  %v1357_v8 = vor.u32 %v1567_v60, %v1356_v59 }
  0x31   :  { %704 = vmatpush.bf16.msrb.mxu0 %v1325_v9  ;;  %v1549_v2 = vld [vmem:[#allocation2 + $0x204] sm:$0xf0]  ;;  %v1484_v5 = vld [vmem:[#allocation2 + $0x4] sm:$0xf]  ;;  %v1530_v7 = vld [vmem:[#allocation2 + $0x174] sm:$0xf]  ;;  %v1105_v12 = vor.u32 %v1502_v61, %v1102_v0 }
  0x32   :  { %755 = vmatpush.bf16.msra.mxu2 %v1145_v6  ;;  %v1030_v6 = vld [vmem:[#allocation2 + $0x8] sm:$0xf0]  ;;  %v1214_v9 = vld [vmem:[#allocation2 + $0x178] sm:$0xf0]  ;;  %v1348_v13 = vld [vmem:[#allocation2 + $0x280] sm:$0xf]  ;;  %v1285_v16 = vor.u32 %v1549_v2, %v1284_v1 }
  0x33   :  { %743 = vmatpush.bf16.msrb.mxu3 %v1073_v10  ;;  %v1562_v10 = vld [vmem:[#allocation2 + $0x274] sm:$0xf]  ;;  %v1342_v11 = vld [vmem:[#allocation2 + $0x278] sm:$0xf0]  ;;  %v1565_v14 = vld [vmem:[#allocation2 + $0x284] sm:$0xf0] }
  0x34   :  { %717 = vmatpush.bf16.msrb.mxu1 %v1389_v17  ;;  %v42_v15 = vld [vmem:[%s1812_s0 + $0x20] sm:$0xff]  ;;  %v1033_v17 = vor.u32 %v1484_v5, %v1030_v6  ;;  %v1094_v19 = vld [vmem:[#allocation2 + $0x88] sm:$0xf0]  ;;  %v1546_v20 = vld [vmem:[#allocation2 + $0x1f4] sm:$0xf]  ;;  %v1349_v26 = vor.u32 %v1565_v14, %v1348_v13 }
  0x35   :  { %705 = vmatpush.bf16.msrb.mxu0 %v1317_v21  ;;  %v1217_v21 = vor.u32 %v1530_v7, %v1214_v9  ;;  %v1278_v23 = vld [vmem:[#allocation2 + $0x1f8] sm:$0xf0]  ;;  %v1578_v24 = vld [vmem:[#allocation2 + $0x2f4] sm:$0xf]  ;;  %v43_v27 = vld [vmem:[%s1812_s0 + $0x28] sm:$0xff] }
  0x36   :  { %756 = vmatpush.bf16.msra.mxu2 %v1137_v18  ;;  %v1500_v18 = vld [vmem:[#allocation2 + $0x84] sm:$0xf]  ;;  %v1406_v25 = vld [vmem:[#allocation2 + $0x2f8] sm:$0xf0]  ;;  %v1334_v33 = vld [vmem:[#allocation2 + $0x268] sm:$0xf0]  ;;  %v1743_v37 = vpack.c.bf16 %v43_v27, %v43_v27 }
  0x37   :  { %744 = vmatpush.bf16.msrb.mxu3 %v1065_v22  ;;  %v1345_v22 = vor.u32 %v1562_v10, %v1342_v11  ;;  %v1528_v28 = vld [vmem:[#allocation2 + $0x164] sm:$0xf]  ;;  %v1097_v31 = vor.u32 %v1500_v18, %v1094_v19  ;;  %v1270_v39 = vld [vmem:[#allocation2 + $0x1e8] sm:$0xf0]  ;;  %v1198_v45 = vld [vmem:[#allocation2 + $0x158] sm:$0xf0] }
  0x38   :  { %718 = vmatpush.bf16.msrb.mxu1 %v1381_v29  ;;  %v1206_v29 = vld [vmem:[#allocation2 + $0x168] sm:$0xf0]  ;;  %v1560_v32 = vld [vmem:[#allocation2 + $0x264] sm:$0xf]  ;;  %v1558_v46 = vld [vmem:[#allocation2 + $0x254] sm:$0xf] }
  0x39   :  { %706 = vmatpush.bf16.msrb.mxu0 %v1309_v34  ;;  %1418 = vmatmul.msk.bf16.vlgmr.msrb.gmra.mxu2 %vm646_vm0, %v1731_v43  ;;  %v1281_v34 = vor.u32 %v1546_v20, %v1278_v23  ;;  %v1544_v36 = vld [vmem:[#allocation2 + $0x1e4] sm:$0xf]  ;;  %v1209_v38 = vor.u32 %v1528_v28, %v1206_v29  ;;  %v1398_v41 = vld [vmem:[#allocation2 + $0x2e8] sm:$0xf0]  ;;  %v1542_v50 = vld [vmem:[#allocation2 + $0x1d4] sm:$0xf] }
  0x3a   :  { %757 = vmatpush.bf16.msra.mxu2 %v1129_v30  ;;  %v1741_v30 = vpack.c.bf16 %v42_v15, %v42_v15  ;;  %v1576_v40 = vld [vmem:[#allocation2 + $0x2e4] sm:$0xf]  ;;  %v1262_v53 = vld [vmem:[#allocation2 + $0x1d8] sm:$0xf0]  ;;  %v1574_v54 = vld [vmem:[#allocation2 + $0x2d4] sm:$0xf] }
  0x3b   :  { %745 = vmatpush.bf16.msrb.mxu3 %v1057_v35  ;;  %v1409_v35 = vor.u32 %v1578_v24, %v1406_v25  ;;  %v1401_v49 = vor.u32 %v1576_v40, %v1398_v41  ;;  %v1390_v55 = vld [vmem:[#allocation2 + $0x2d8] sm:$0xf0]  ;;  %v1190_v59 = vld [vmem:[#allocation2 + $0x148] sm:$0xf0]  ;;  %v1556_v60 = vld [vmem:[#allocation2 + $0x244] sm:$0xf] }
  0x3c   :  { %719 = vmatpush.bf16.msrb.mxu1 %v1373_v42  ;;  %v1337_v42 = vor.u32 %v1560_v32, %v1334_v33  ;;  %v1318_v61 = vld [vmem:[#allocation2 + $0x248] sm:$0xf0]  ;;  %v1540_v0 = vld [vmem:[#allocation2 + $0x1c4] sm:$0xf]  ;;  %v1182_v9 = vld [vmem:[#allocation2 + $0x138] sm:$0xf0] }
  0x3d   :  { %707 = vmatpush.bf16.msrb.mxu0 %v1301_v47  ;;  %v1326_v47 = vld [vmem:[#allocation2 + $0x258] sm:$0xf0]  ;;  %v1254_v2 = vld [vmem:[#allocation2 + $0x1c8] sm:$0xf0]  ;;  %v1572_v5 = vld [vmem:[#allocation2 + $0x2c4] sm:$0xf]  ;;  %v1321_v7 = vor.u32 %v1556_v60, %v1318_v61 }
  0x3e   :  { %758 = vmatpush.bf16.msra.mxu2 %v1121_v44  ;;  %v1526_v44 = vld [vmem:[#allocation2 + $0x154] sm:$0xf]  ;;  %v1382_v6 = vld [vmem:[#allocation2 + $0x2c8] sm:$0xf0]  ;;  %v1257_v11 = vor.u32 %v1540_v0, %v1254_v2  ;;  %v1246_v14 = vld [vmem:[#allocation2 + $0x1b8] sm:$0xf0] }
  0x3f   :  { %746 = vmatpush.bf16.msrb.mxu3 %v1049_v48  ;;  %v1273_v48 = vor.u32 %v1544_v36, %v1270_v39  ;;  %v1201_v52 = vor.u32 %v1526_v44, %v1198_v45  ;;  %v1554_v10 = vld [vmem:[#allocation2 + $0x234] sm:$0xf]  ;;  %v1520_v18 = vld [vmem:[#allocation2 + $0x124] sm:$0xf]  ;;  %v1174_v19 = vld [vmem:[#allocation2 + $0x128] sm:$0xf0] }
  0x40   :  { %720 = vmatpush.bf16.msrb.mxu1 %v1365_v56  ;;  %v1329_v56 = vor.u32 %v1558_v46, %v1326_v47  ;;  %v1570_v15 = vld [vmem:[#allocation2 + $0x2b4] sm:$0xf]  ;;  %v1552_v20 = vld [vmem:[#allocation2 + $0x224] sm:$0xf]  ;;  %v1177_v25 = vor.u32 %v1520_v18, %v1174_v19  ;;  %v1366_v28 = vld [vmem:[#allocation2 + $0x2a8] sm:$0xf0] }
  0x41   :  { %708 = vmatpush.bf16.msrb.mxu0 %v1293_v62  ;;  %v1265_v62 = vor.u32 %v1542_v50, %v1262_v53  ;;  %v1536_v24 = vld [vmem:[#allocation2 + $0x1a4] sm:$0xf]  ;;  %v1166_v32 = vld [vmem:[#allocation2 + $0x118] sm:$0xf0]  ;;  %v1550_v33 = vld [vmem:[#allocation2 + $0x214] sm:$0xf] }
  0x42   :  { %759 = vmatpush.bf16.msra.mxu2 %v1113_v57  ;;  %v1524_v57 = vld [vmem:[#allocation2 + $0x144] sm:$0xf]  ;;  %v1230_v40 = vld [vmem:[#allocation2 + $0x198] sm:$0xf0]  ;;  %v1566_v41 = vld [vmem:[#allocation2 + $0x294] sm:$0xf] }
  0x43   :  { %747 = vmatpush.bf16.msrb.mxu3 %v1041_v63  ;;  %v1393_v63 = vor.u32 %v1574_v54, %v1390_v55  ;;  %v1193_v1 = vor.u32 %v1524_v57, %v1190_v59  ;;  %v1568_v27 = vld [vmem:[#allocation2 + $0x2a4] sm:$0xf]  ;;  %v1158_v46 = vld [vmem:[#allocation2 + $0x108] sm:$0xf0]  ;;  %v1589_v0 = vld [vmem:[%s1815_s3 + $0x38] sm:$0xff] }
  0x44   :  { %721 = vmatpush.bf16.msrb.mxu1 %v1357_v8  ;;  %v1522_v8 = vld [vmem:[#allocation2 + $0x134] sm:$0xf]  ;;  %v1369_v36 = vor.u32 %v1568_v27, %v1366_v28  ;;  %v1516_v45 = vld [vmem:[#allocation2 + $0x104] sm:$0xf]  ;;  %v1414_v50 = vld [vmem:[#allocation2 + $0x308] sm:$0xf0] }
  0x45   :  { %709 = vmatpush.bf16.msrb.mxu0 %v1285_v16  ;;  %v1185_v13 = vor.u32 %v1522_v8, %v1182_v9  ;;  %v1374_v16 = vld [vmem:[#allocation2 + $0x2b8] sm:$0xf0]  ;;  %v1548_v47 = vld [vmem:[#allocation2 + $0x204] sm:$0xf]  ;;  %v1161_v54 = vor.u32 %v1516_v45, %v1158_v46  ;;  %v1350_v60 = vld [vmem:[#allocation2 + $0x288] sm:$0xf0] }
  0x46   :  { %760 = vmatpush.bf16.msra.mxu2 %v1105_v12  ;;  %v1538_v12 = vld [vmem:[#allocation2 + $0x1b4] sm:$0xf]  ;;  %v1377_v23 = vor.u32 %v1570_v15, %v1374_v16  ;;  %v1532_v55 = vld [vmem:[#allocation2 + $0x184] sm:$0xf]  ;;  %v150_v2 = vld [vmem:[%s1814_s2] sm:$0x3] }
  0x47   :  { %748 = vmatpush.bf16.msrb.mxu3 %v1033_v17  ;;  %v1564_v59 = vld [vmem:[#allocation2 + $0x284] sm:$0xf]  ;;  %v152_v9 = vperm.slane %v150_v2, 0  ;;  %v1592_v45 = vld [vmem:[%s1815_s3 + $0x50] sm:$0xff] }
  0x48   :  { %722 = vmatpush.bf16.msrb.mxu1 %v1349_v26  ;;  %710 = vmatmul.bf16.vlgmr.msrb.gmra.mxu0 %v1741_v30  ;;  %v1238_v26 = vld [vmem:[#allocation2 + $0x1a8] sm:$0xf0]  ;;  %v1582_v15 = vld [vmem:[%s1815_s3] sm:$0xff] }
  0x49   :  { %767 = vmatpush.bf16.msra.mxu0 %v1217_v21  ;;  %v1302_v21 = vld [vmem:[#allocation2 + $0x228] sm:$0xf0] }
  0x4a   :  { %761 = vmatpush.bf16.msra.mxu2 %v1097_v31  ;;  %749 = vmatmul.bf16.vlgmr.msrb.gmra.mxu3 %v1718_v58  ;;  %v1385_v58 = vor.u32 %v1572_v5, %v1382_v6  ;;  %v1305_v29 = vor.u32 %v1552_v20, %v1302_v21  ;;  %v1518_v31 = vld [vmem:[#allocation2 + $0x114] sm:$0xf] }
  0x4b   :  { %793 = vmatpush.bf16.msra.mxu3 %v1345_v22  ;;  %723 = vmatmul.bf16.vlgmr.msrb.gmra.mxu1 %v1743_v37  ;;  %v1249_v22 = vor.u32 %v1538_v12, %v1246_v14  ;;  %v1169_v39 = vor.u32 %v1518_v31, %v1166_v32  ;;  %v1583_v12 = vld [vmem:[%s1815_s3 + $0x8] sm:$0xff]  ;;  %v1596_v32 = vld [vmem:[%s1815_s3 + $0x70] sm:$0xff] }
  0x4c   :  { %780 = vmatpush.bf16.msra.mxu1 %v1281_v34  ;;  %v1294_v34 = vld [vmem:[#allocation2 + $0x218] sm:$0xf0] }
  0x4d   :  { %768 = vmatpush.bf16.msra.mxu0 %v1209_v38  ;;  %762 = vmatmul.bf16.vlgmr.msra.gmra.mxu2 %v1722_v4  ;;  %v1310_v4 = vld [vmem:[#allocation2 + $0x238] sm:$0xf0]  ;;  %v1534_v38 = vld [vmem:[#allocation2 + $0x194] sm:$0xf]  ;;  %v1297_v44 = vor.u32 %v1550_v33, %v1294_v34  ;;  %v1595_v33 = vld [vmem:[%s1815_s3 + $0x68] sm:$0xff] }
  0x4e   :  { %806 = vmatpush.bf16.msrb.mxu2 %v1409_v35  ;;  %v1313_v17 = vor.u32 %v1554_v10, %v1310_v4  ;;  %v1241_v35 = vor.u32 %v1536_v24, %v1238_v26  ;;  %v1584_v4 = vld [vmem:[%s1815_s3 + $0x10] sm:$0xff]  ;;  %v1597_v24 = vld [vmem:[%s1815_s3 + $0x78] sm:$0xff] }
  0x4f   :  { %794 = vmatpush.bf16.msra.mxu3 %v1337_v42  ;;  %v1358_v42 = vld [vmem:[#allocation2 + $0x298] sm:$0xf0] }
  0x50   :  { %781 = vmatpush.bf16.msra.mxu1 %v1273_v48  ;;  %v1286_v48 = vld [vmem:[#allocation2 + $0x208] sm:$0xf0]  ;;  %v1361_v53 = vor.u32 %v1566_v41, %v1358_v42  ;;  %v1593_v41 = vld [vmem:[%s1815_s3 + $0x58] sm:$0xff] }
  0x51   :  { %769 = vmatpush.bf16.msra.mxu0 %v1201_v52  ;;  %v1233_v52 = vor.u32 %v1534_v38, %v1230_v40  ;;  %v1289_v57 = vor.u32 %v1548_v47, %v1286_v48  ;;  %v153_v40 = vperm.slane %v150_v2, 1 }
  0x52   :  { %807 = vmatpush.bf16.msrb.mxu2 %v1401_v49  ;;  %v1580_v49 = vld [vmem:[#allocation2 + $0x304] sm:$0xf] }
  0x53   :  { %795 = vmatpush.bf16.msra.mxu3 %v1329_v56  ;;  %v1222_v56 = vld [vmem:[#allocation2 + $0x188] sm:$0xf0]  ;;  %v1417_v61 = vor.u32 %v1580_v49, %v1414_v50 }
  0x54   :  { %782 = vmatpush.bf16.msra.mxu1 %v1265_v62  ;;  %v1225_v62 = vor.u32 %v1532_v55, %v1222_v56  ;;  %v1591_v49 = vld [vmem:[%s1815_s3 + $0x48] sm:$0xff] }
  0x55   :  { %770 = vmatpush.bf16.msra.mxu0 %v1193_v1  ;;  %v1588_v1 = vld [vmem:[%s1815_s3 + $0x30] sm:$0xff] }
  0x56   :  { %808 = vmatpush.bf16.msrb.mxu2 %v1393_v63  ;;  %v1353_v63 = vor.u32 %v1564_v59, %v1350_v60 }
  0x57   :  { %796 = vmatpush.bf16.msra.mxu3 %v1321_v7  ;;  %v1585_v7 = vld [vmem:[%s1815_s3 + $0x18] sm:$0xff] }
  0x58   :  { %783 = vmatpush.bf16.msra.mxu1 %v1257_v11 }
  0x59   :  { %771 = vmatpush.bf16.msra.mxu0 %v1185_v13 }
  0x5a   :  { %809 = vmatpush.bf16.msrb.mxu2 %v1385_v58 }
  0x5b   :  { %797 = vmatpush.bf16.msra.mxu3 %v1313_v17 }
  0x5c   :  { %784 = vmatpush.bf16.msra.mxu1 %v1249_v22 }
  0x5d   :  { %772 = vmatpush.bf16.msra.mxu0 %v1177_v25 }
  0x5e   :  { %810 = vmatpush.bf16.msrb.mxu2 %v1377_v23 }
  0x5f   :  { %798 = vmatpush.bf16.msra.mxu3 %v1305_v29 }
  0x60   :  { %785 = vmatpush.bf16.msra.mxu1 %v1241_v35 }
  0x61   :  { %773 = vmatpush.bf16.msra.mxu0 %v1169_v39  ;;  %v1594_v39 = vld [vmem:[%s1815_s3 + $0x60] sm:$0xff] }
  0x62   :  { %811 = vmatpush.bf16.msrb.mxu2 %v1369_v36 }
  0x63   :  { %799 = vmatpush.bf16.msra.mxu3 %v1297_v44 }
  0x64   :  { %786 = vmatpush.bf16.msra.mxu1 %v1233_v52 }
  0x65   :  { %774 = vmatpush.bf16.msra.mxu0 %v1161_v54 }
  0x66   :  { %812 = vmatpush.bf16.msrb.mxu2 %v1361_v53  ;;  %v1590_v53 = vld [vmem:[%s1815_s3 + $0x40] sm:$0xff] }
  0x67   :  { %800 = vmatpush.bf16.msra.mxu3 %v1289_v57 }
  0x68   :  { %787 = vmatpush.bf16.msra.mxu1 %v1225_v62  ;;  %775 = vmatmul.bf16.vlgmr.msra.gmra.mxu0 %v1710_v51 }
  0x69   :  { %826 = vmatpush.bf16.msrb.mxu0 %v1417_v61 }
  0x6a   :  { %801 = vmatmul.bf16.vlgmr.msra.gmra.mxu3 %v1741_v30  ;;  %813 = vmatpush.bf16.msrb.mxu2 %v1353_v63 }
  0x6b   :  { %788 = vmatmul.bf16.vlgmr.msra.gmra.mxu1 %v1720_v3  ;;  %v1587_v3 = vld [vmem:[%s1815_s3 + $0x28] sm:$0xff]  ;;  %989 = vmatpush.bf16.msrb.mxu3 %v1597_v24 }
  0x6c   :  { %976 = vmatpush.bf16.msrb.mxu1 %v1589_v0 }
  0x6d   :  { %814 = vmatmul.bf16.vlgmr.msrb.gmra.mxu2 %v1743_v37 }
  0x6f   :  { %990 = vmatpush.bf16.msrb.mxu3 %v1596_v32 }
  0x70   :  { %977 = vmatpush.bf16.msrb.mxu1 %v1588_v1 }
  0x73   :  { %991 = vmatpush.bf16.msrb.mxu3 %v1595_v33 }
  0x74   :  { %978 = vmatpush.bf16.msrb.mxu1 %v1587_v3 }
  0x77   :  { %992 = vmatpush.bf16.msrb.mxu3 %v1594_v39 }
  0x78   :  { %1419 = vmatmul.msk.bf16.vlgmr.msrb.gmra.mxu0 %vm646_vm0, %v1731_v43  ;;  %v1586_v43 = vld [vmem:[%s1815_s3 + $0x20] sm:$0xff] }
  0x79   :  { %979 = vmatpush.bf16.msrb.mxu1 %v1586_v43 }
  0x7b   :  { %993 = vmatpush.bf16.msrb.mxu3 %v1593_v41 }
  0x7d   :  { %980 = vmatpush.bf16.msrb.mxu1 %v1585_v7 }
  0x7f   :  { %994 = vmatpush.bf16.msrb.mxu3 %v1592_v45 }
  0x81   :  { %981 = vmatpush.bf16.msrb.mxu1 %v1584_v4 }
  0x83   :  { %995 = vmatpush.bf16.msrb.mxu3 %v1591_v49 }
  0x85   :  { %982 = vmatpush.bf16.msrb.mxu1 %v1583_v12 }
  0x87   :  { %996 = vmatpush.bf16.msrb.mxu3 %v1590_v53 }
  0x89   :  { %983 = vmatpush.bf16.msrb.mxu1 %v1582_v15 }
  0xa5   :  { %v659_v51 = vpop.f32.mrf.mxu0 }
  0xa6   :  { %v660_v11 = vadd.f32 %v659_v51, %v152_v9 }
  0xa8   :  { %v672_v30 = vpop.f32.mrf.mxu1 }
  0xa9   :  { %v673_v13 = vadd.f32 %v672_v30, %v660_v11 }
  0xac   :  { %v685_v37 = vpop.f32.mrf.mxu2 }
  0xad   :  { %v698_v5 = vpop.f32.mrf.mxu3  ;;  %v661_v6 = vpop.f32.mrf.mxu0  ;;  %v686_v16 = vadd.f32 %v685_v37, %v673_v13 }
  0xaf   :  { %v699_v17 = vadd.f32 %v698_v5, %v686_v16 }
  0xb0   :  { %v674_v8 = vpop.f32.mrf.mxu1 }
  0xb1   :  { %v1602_v8 = vld [vmem:[%s1816_s4] ss:$0 sm:$0xff] }
  0xb4   :  { %v687_v10 = vpop.f32.mrf.mxu2 }
  0xb5   :  { %v700_v58 = vpop.f32.mrf.mxu3 }
  0xbc   :  { %v737_v14 = vpop.f32.mrf.mxu2 }
  0xc4   :  { %v739_v20 = vpop.f32.mrf.mxu2 }
  0xc5   :  { %v711_v18 = vpop.f32.mrf.mxu0 }
  0xc6   :  { %v712_v19 = vadd.f32 %v711_v18, %v699_v17 }
  0xc8   :  { %v724_v21 = vpop.f32.mrf.mxu1 }
  0xc9   :  { %v725_v22 = vadd.f32 %v724_v21, %v712_v19 }
  0xcb   :  { %v738_v23 = vadd.f32 %v737_v14, %v725_v22 }
  0xcd   :  { %v832_v25 = vsub.f32 0.0, %v738_v23  ;;  %v713_v26 = vpop.f32.mrf.mxu0  ;;  %v750_v29 = vpop.f32.mrf.mxu3 }
  0xce   :  { %v751_v44 = vadd.f32 %v750_v29, %v153_v40 }
  0xcf   :  { %v834_v27 = vmul.f32 1.442695, %v832_v25 }
  0xd0   :  { %v763_v28 = vpop.f32.mrf.mxu2  ;;  %v726_v31 = vpop.f32.mrf.mxu1 }
  0xd1   :  { %1603 = vpow2.f32 %v834_v27  ;;  %v764_v48 = vadd.f32 %v763_v28, %v751_v44 }
  0xd5   :  { %v752_v38 = vpop.f32.mrf.mxu3 }
  0xd7   :  { %v1604_v34 = vpop.eup %1603 }
  0xd8   :  { %v765_v35 = vpop.f32.mrf.mxu2  ;;  %v838_v36 = vadd.f32 1.0, %v1604_v34 }
  0xda   :  { %1605 = vrcp.f32 %v838_v36 }
  0xe0   :  { %v1606_v42 = vpop.eup %1605 }
  0xe1   :  { %v842_v46 = vpack.c.bf16 %v1606_v42, %v1606_v42 }
  0xe3   :  { %984 = vmatmul.bf16.vlgmr.msrb.gmra.mxu1 %v842_v46 }
  0xe5   :  { %v776_v47 = vpop.f32.mrf.mxu0 }
  0xe6   :  { %v777_v52 = vadd.f32 %v776_v47, %v764_v48 }
  0xe8   :  { %v789_v50 = vpop.f32.mrf.mxu1 }
  0xe9   :  { %v790_v56 = vadd.f32 %v789_v50, %v777_v52 }
  0xed   :  { %v802_v54 = vpop.f32.mrf.mxu3  ;;  %v778_v55 = vpop.f32.mrf.mxu0 }
  0xee   :  { %v803_v59 = vadd.f32 %v802_v54, %v790_v56 }
  0xf0   :  { %v815_v57 = vpop.f32.mrf.mxu2  ;;  %v791_v60 = vpop.f32.mrf.mxu1 }
  0xf1   :  { %v816_v61 = vadd.f32 %v815_v57, %v803_v59 }
  0xf5   :  { %v804_v62 = vpop.f32.mrf.mxu3  ;;  %v828_v63 = vpop.f32.mrf.mxu0 }
  0xf6   :  { %v829_v0 = vadd.f32 %v828_v63, %v816_v61 }
  0xf8   :  { %v817_v1 = vpop.f32.mrf.mxu2  ;;  %v833_v51 = vsub.f32 0.0, %v829_v0 }
  0xfa   :  { %v836_v3 = vmul.f32 1.442695, %v833_v51 }
  0xfc   :  { %1607 = vpow2.f32 %v836_v3 }
  0xfd   :  { %v830_v30 = vpop.f32.mrf.mxu0 }
 0x102   :  { %v1608_v37 = vpop.eup %1607 }
 0x103   :  { %v839_v43 = vadd.f32 1.0, %v1608_v37 }
 0x105   :  { %1609 = vrcp.f32 %v839_v43 }
 0x10b   :  { %v1610_v2 = vpop.eup %1609 }
 0x10c   :  { %v843_v5 = vpack.c.bf16 %v1610_v2, %v1610_v2 }
 0x10e   :  { %997 = vmatmul.bf16.vlgmr.msrb.gmra.mxu3 %v843_v5 }
 0x160   :  { %v985_v6 = vpop.f32.mrf.mxu1 }
 0x161   :  { %v986_v9 = vadd.f32 %v1602_v8, %v985_v6 }
 0x168   :  { %v987_v7 = vpop.f32.mrf.mxu1 }
 0x191   :  { %v998_v10 = vpop.f32.mrf.mxu3 }
 0x192   :  { %v999_v4 = vadd.f32 %v998_v10, %v986_v9 }
 0x194   :  { %v1002_v11 = vsub.f32 0.0, %v999_v4 }
 0x196   :  { %v1003_v58 = vmul.f32 1.442695, %v1002_v11 }
 0x198   :  { %1611 = vpow2.f32 %v1003_v58 }
 0x199   :  { %v1000_v12 = vpop.f32.mrf.mxu3 }
 0x19e   :  { %v1612_v13 = vpop.eup %1611 }
 0x19f   :  { %v1005_v14 = vadd.f32 1.0, %v1612_v13 }
 0x1a1   :  { %1613 = vrcp.f32 %v1005_v14 }
 0x1a7   :  { %v1614_v15 = vpop.eup %1613 }
 0x1a8   :  { %1008 = vst.msk [vmem:[#allocation5] sm:$0xff] %vm1007_vm1, %v1614_v15 }
 0x1a9   :  { %1019 = dma.vmem_to_hbm [thread:$0]  %s1015_s20, 128, %s1017_s23, [#allocation4]  }
 0x1aa   :  { %1665 = dma.done.wait [#allocation4], 128  }
 0x1ab   :  { %1666 = vsyncadd [#allocation4], 4294967168 }
 0x1ac   :  { %1024 = vsyncpa [#allocation3], 1 }
 0x1ad   :  { %1025 = vsyncpa [#allocation4], 1 }

</bundles_post_ra>
